<compile_context>
chip_gen: v7x
topology: tpu7x:2x2x1
jax: 0.10.0
libtpu: 0.0.40
codegen_flags: <defaults>
</compile_context>

<pallas_src>
import functools

import jax
import jax.numpy as jnp
from jax import lax
from jax.experimental import pallas as pl
from jax.experimental.pallas import tpu as pltpu


# --------------------------------------------------------------------------
# Kernel A: S = softmax(S_param / temp), gene_pool = S^T @ gene_embed
# Grid: (gene tiles,)  -- "arbitrary" (gene_pool accumulates across it).
# --------------------------------------------------------------------------
def _softmax_genepool_kernel(s_param_ref, gene_embed_ref, s_ref, gene_pool_ref,
                             *, inv_temp):
    g = pl.program_id(0)

    logits = s_param_ref[...] * jnp.float32(inv_temp)              # [TN, K]
    m = jnp.max(logits, axis=-1, keepdims=True)
    e = jnp.exp(logits - m)
    s = e / jnp.sum(e, axis=-1, keepdims=True)                     # softmax over meta
    s_ref[...] = s

    # gene_pool += S_g^T @ gene_embed_g  (contract dim 0 of both; no S.T copy).
    part = lax.dot_general(
        s, gene_embed_ref[...],
        dimension_numbers=(((0,), (0,)), ((), ())),
        preferred_element_type=jnp.float32)                        # [K, D]

    @pl.when(g == 0)
    def _():
        gene_pool_ref[...] = part

    @pl.when(g > 0)
    def _():
        gene_pool_ref[...] += part


# --------------------------------------------------------------------------
# Kernel B: expr_pool = expr @ S   (+ optional log_norm at finalize)
# Grid: (cell tiles "parallel", gene tiles "arbitrary").
# --------------------------------------------------------------------------
def _exprpool_kernel(expr_ref, s_ref, expr_pool_ref, *, log_norm):
    g = pl.program_id(1)

    part = jnp.dot(expr_ref[...], s_ref[...],
                   preferred_element_type=jnp.float32)             # [TC, K] f32

    @pl.when(g == 0)
    def _():
        expr_pool_ref[...] = part

    @pl.when(g > 0)
    def _():
        expr_pool_ref[...] += part

    if log_norm:
        @pl.when(g == pl.num_programs(1) - 1)
        def _():
            ep = expr_pool_ref[...]
            denom = jnp.sum(ep, axis=-1, keepdims=True) + jnp.float32(1e-4)
            ep = ep * pl.reciprocal(denom, approx=True) * jnp.float32(1e5)
            expr_pool_ref[...] = jnp.log1p(ep)


def _vmem_limit(buffer_bytes, headroom=4 << 20, floor=32 << 20, ceiling=64 << 20):
    """Scoped-VMEM request: pipelined+resident buffers plus headroom, clamped.

    64 MiB ceiling is safe on every generation (v7x physical VMEM per TC);
    raise it on v5e/v6e if very large tiles are used.
    """
    return int(min(max(buffer_bytes + headroom, floor), ceiling))


def genepool_forward(S_param, expr, gene_embed, *, temp=0.5, log_norm=True,
                     cell_tile=256, gene_tile=512,
                     matmul_dtype=jnp.float32):
    """Fused GenePoolVanilla forward. Returns (S, gene_pool, expr_pool)."""
    N, K = S_param.shape
    C, N2 = expr.shape
    Ng, D = gene_embed.shape
    assert N2 == N and Ng == N, "gene dimension mismatch"

    TN = min(gene_tile, N)
    TC = min(cell_tile, C)
    assert N % TN == 0, "n_genes must be divisible by the gene tile"
    assert C % TC == 0, "n_cells must be divisible by the cell tile"
    assert (TN % 128 == 0) or (TN == N), "gene tile must be 128-aligned or full"
    assert (TC % 8 == 0) or (TC == C), "cell tile must be 8-aligned or full"

    f32 = jnp.float32
    inv_temp = float(1.0 / temp)
    n_gene_tiles = N // TN
    n_cell_tiles = C // TC

    # ---------------- call A: softmax + gene_pool --------------------------
    a_kernel = functools.partial(_softmax_genepool_kernel, inv_temp=inv_temp)
    a_bytes = (2 * TN * K + 2 * TN * D + 2 * TN * K + 1 * K * D) * 4
    a_cost = pl.CostEstimate(
        flops=2 * N * K * D + 4 * N * K,
        transcendentals=N * K,
        bytes_accessed=(2 * N * K + N * D + K * D) * 4)

    S, gene_pool = pl.pallas_call(
        a_kernel,
        out_shape=(jax.ShapeDtypeStruct((N, K), f32),      # S
                   jax.ShapeDtypeStruct((K, D), f32)),      # gene_pool
        grid_spec=pltpu.PrefetchScalarGridSpec(
            num_scalar_prefetch=0,
            grid=(n_gene_tiles,),
            in_specs=[
                pl.BlockSpec((TN, K), lambda g: (g, 0)),    # S_param tile
                pl.BlockSpec((TN, D), lambda g: (g, 0)),    # gene_embed tile
            ],
            out_specs=(
                pl.BlockSpec((TN, K), lambda g: (g, 0)),    # S tile
                # Resident accumulator (constant index) -> single-buffered.
                pl.BlockSpec((K, D), lambda g: (0, 0),
                             pipeline_mode=pl.Buffered(1)),
            ),
        ),
        compiler_params=pltpu.CompilerParams(
            dimension_semantics=("arbitrary",),
            vmem_limit_bytes=_vmem_limit(a_bytes)),
        cost_estimate=a_cost,
    )(S_param.astype(f32), gene_embed.astype(f32))

    # ---------------- call B: expr_pool = expr @ S --------------------------
    mm_dtype = jnp.dtype(matmul_dtype)
    itm = mm_dtype.itemsize
    expr_mm = expr.astype(mm_dtype)    # bf16 here halves DMA on v6e/v7x
    s_mm = S.astype(mm_dtype)

    s_resident = (n_gene_tiles == 1)
    if s_resident:
        s_spec = pl.BlockSpec((TN, K), lambda i, g: (0, 0),
                              pipeline_mode=pl.Buffered(1))
    else:
        s_spec = pl.BlockSpec((TN, K), lambda i, g: (g, 0))

    b_bytes = (2 * TC * TN * itm
               + (1 if s_resident else 2) * TN * K * itm
               + 2 * TC * K * 4)
    b_cost = pl.CostEstimate(
        flops=2 * C * N * K,
        transcendentals=(C * K if log_norm else 0),
        bytes_accessed=C * N * itm + N * K * itm + C * K * 4)
    b_kernel = functools.partial(_exprpool_kernel, log_norm=bool(log_norm))

    expr_pool = pl.pallas_call(
        b_kernel,
        out_shape=jax.ShapeDtypeStruct((C, K), f32),
        grid_spec=pltpu.PrefetchScalarGridSpec(
            num_scalar_prefetch=0,
            grid=(n_cell_tiles, n_gene_tiles),
            in_specs=[
                pl.BlockSpec((TC, TN), lambda i, g: (i, g)),   # expr tile
                s_spec,                                        # S tile
            ],
            out_specs=pl.BlockSpec((TC, K), lambda i, g: (i, 0)),
        ),
        compiler_params=pltpu.CompilerParams(
            dimension_semantics=("parallel", "arbitrary"),
            vmem_limit_bytes=_vmem_limit(b_bytes)),
        cost_estimate=b_cost,
    )(expr_mm, s_mm)

    return S, gene_pool, expr_pool


def genepool_reference(S_param, expr, gene_embed, *, temp=0.5, log_norm=True):
    """Pure-JAX mirror of the PyTorch forward, for validation."""
    S = jax.nn.softmax(S_param / temp, axis=1)
    expr_pool = expr @ S
    gene_pool = S.T @ gene_embed
    if log_norm:
        expr_pool = expr_pool / (jnp.sum(expr_pool, axis=1, keepdims=True) + 1e-4) * 1e5
        expr_pool = jnp.log1p(expr_pool)
    return S, gene_pool, expr_pool


if __name__ == "__main__":
    # Small deterministic problem: 128 genes, 128 meta-genes (lane-dense),
    # 64 cells, 32-dim gene embeddings, temp=0.5 (module default).
    N_GENES, N_META, N_CELLS, D_EMBED, TEMP = 128, 128, 64, 32, 0.5

    key = jax.random.PRNGKey(0)
    ks, ke, kg = jax.random.split(key, 3)

    S_param = jax.random.uniform(ks, (N_GENES, N_META), dtype=jnp.float32)
    expr = jax.random.uniform(ke, (N_CELLS, N_GENES), dtype=jnp.float32) * 5.0
    gene_embed = jax.random.normal(kg, (N_GENES, D_EMBED), dtype=jnp.float32)

    # f32 path (exact match to the reference).
    S, gene_pool, expr_pool = genepool_forward(
        S_param, expr, gene_embed, temp=TEMP, log_norm=True)
    jax.block_until_ready((S, gene_pool, expr_pool))

    S_ref, gp_ref, ep_ref = genepool_reference(
        S_param, expr, gene_embed, temp=TEMP, log_norm=True)

    assert S.shape == (N_GENES, N_META)
    assert gene_pool.shape == (N_META, D_EMBED)
    assert expr_pool.shape == (N_CELLS, N_META)
    assert jnp.allclose(S, S_ref, atol=1e-5, rtol=1e-5)
    assert jnp.allclose(gene_pool, gp_ref, atol=1e-4, rtol=1e-4)
    assert jnp.allclose(expr_pool, ep_ref, atol=1e-3, rtol=1e-3)

    # log_norm=False path.
    _, _, ep2 = genepool_forward(
        S_param, expr, gene_embed, temp=TEMP, log_norm=False)
    jax.block_until_ready(ep2)
    _, _, ep2_ref = genepool_reference(
        S_param, expr, gene_embed, temp=TEMP, log_norm=False)
    assert jnp.allclose(ep2, ep2_ref, atol=1e-4, rtol=1e-4)

    # bf16 matmul-input path (v6e / v7x MXU rate); accumulation stays f32.
    _, _, ep3 = genepool_forward(
        S_param, expr, gene_embed, temp=TEMP, log_norm=True,
        matmul_dtype=jnp.bfloat16)
    jax.block_until_ready(ep3)
    assert jnp.allclose(ep3, ep_ref, atol=5e-2, rtol=5e-2)

    print("KERNEL_OK")
</pallas_src>

<mosaic_0001>
module attributes {stable_mosaic.version = 11 : i64} {
  func.func @_softmax_genepool_kernel(%arg0: i32, %arg1: memref<128x128xf32, #tpu.memory_space<vmem>>, %arg2: memref<128x32xf32, #tpu.memory_space<vmem>>, %arg3: memref<128x128xf32, #tpu.memory_space<vmem>>, %arg4: memref<128x32xf32, #tpu.memory_space<vmem>>) attributes {dimension_semantics = [#tpu.dimension_semantics<arbitrary>], iteration_bounds = array<i64: 1>, scalar_prefetch = 0 : i64, scratch_operands = 0 : i64, tpu.core_type = #tpu.core_type<tc>, window_params = [{transform_indices = @transform_0, window_bounds = array<i64: 128, 128>}, {transform_indices = @transform_1, window_bounds = array<i64: 128, 32>}, {transform_indices = @transform_2, window_bounds = array<i64: 128, 128>}, {pipeline_mode = #tpu.pipeline_mode<synchronous>, transform_indices = @transform_3, window_bounds = array<i64: 128, 32>}]} {
    %c0 = arith.constant 0 : index
    %c0_0 = arith.constant 0 : index
    %0 = vector.load %arg1[%c0, %c0_0] : memref<128x128xf32, #tpu.memory_space<vmem>>, vector<128x128xf32>
    %cst = arith.constant 2.000000e+00 : f32
    %1 = vector.broadcast %cst : f32 to vector<128x128xf32>
    %2 = arith.mulf %0, %1 : vector<128x128xf32>
    %cst_1 = arith.constant dense<0xFF800000> : vector<128xf32>
    %3 = vector.multi_reduction <maximumf>, %2, %cst_1 [1] : vector<128x128xf32> to vector<128xf32>
    %4 = vector.shape_cast %3 : vector<128xf32> to vector<128x1xf32>
    %5 = vector.broadcast %4 : vector<128x1xf32> to vector<128x128xf32>
    %6 = arith.subf %2, %5 : vector<128x128xf32>
    %7 = math.exp %6 : vector<128x128xf32>
    %cst_2 = arith.constant dense<0.000000e+00> : vector<128xf32>
    %8 = vector.multi_reduction <add>, %7, %cst_2 [1] : vector<128x128xf32> to vector<128xf32>
    %9 = vector.shape_cast %8 : vector<128xf32> to vector<128x1xf32>
    %10 = vector.broadcast %9 : vector<128x1xf32> to vector<128x128xf32>
    %11 = arith.divf %7, %10 : vector<128x128xf32>
    %c0_3 = arith.constant 0 : index
    %c0_4 = arith.constant 0 : index
    %12 = vector.load %arg3[%c0_3, %c0_4] : memref<128x128xf32, #tpu.memory_space<vmem>>, vector<128x128xf32>
    tpu.vector_store %arg3[%c0_3, %c0_4], %11 {strides = array<i32>} : memref<128x128xf32, #tpu.memory_space<vmem>>, vector<128x128xf32>,
    %c0_5 = arith.constant 0 : index
    %c0_6 = arith.constant 0 : index
    %13 = vector.load %arg2[%c0_5, %c0_6] : memref<128x32xf32, #tpu.memory_space<vmem>>, vector<128x32xf32>
    %cst_7 = arith.constant dense<0.000000e+00> : vector<128x32xf32>
    %14 = tpu.matmul %11, %13, %cst_7 {dimension_numbers = #tpu.dot_dimension_numbers<[0], [0], [1], [1], [0, 1, 1, 1], [], []>} : vector<128x128xf32>, vector<128x32xf32>, vector<128x32xf32> -> vector<128x32xf32>
    %c0_i32 = arith.constant 0 : i32
    %15 = arith.cmpi eq, %arg0, %c0_i32 : i32
    %16 = arith.extui %15 : i1 to i32
    %c0_i32_8 = arith.constant 0 : i32
    %17 = arith.cmpi ne, %16, %c0_i32_8 : i32
    scf.if %17 {
      %c0_11 = arith.constant 0 : index
      %c0_12 = arith.constant 0 : index
      %21 = vector.load %arg4[%c0_11, %c0_12] : memref<128x32xf32, #tpu.memory_space<vmem>>, vector<128x32xf32>
      tpu.vector_store %arg4[%c0_11, %c0_12], %14 {strides = array<i32>} : memref<128x32xf32, #tpu.memory_space<vmem>>, vector<128x32xf32>,
    } else {
    }
    %c0_i32_9 = arith.constant 0 : i32
    %18 = arith.cmpi sgt, %arg0, %c0_i32_9 : i32
    %19 = arith.extui %18 : i1 to i32
    %c0_i32_10 = arith.constant 0 : i32
    %20 = arith.cmpi ne, %19, %c0_i32_10 : i32
    scf.if %20 {
      %c0_11 = arith.constant 0 : index
      %c0_12 = arith.constant 0 : index
      %21 = vector.load %arg4[%c0_11, %c0_12] : memref<128x32xf32, #tpu.memory_space<vmem>>, vector<128x32xf32>
      %22 = arith.addf %21, %14 : vector<128x32xf32>
      %c0_13 = arith.constant 0 : index
      %c0_14 = arith.constant 0 : index
      %23 = vector.load %arg4[%c0_13, %c0_14] : memref<128x32xf32, #tpu.memory_space<vmem>>, vector<128x32xf32>
      tpu.vector_store %arg4[%c0_13, %c0_14], %22 {strides = array<i32>} : memref<128x32xf32, #tpu.memory_space<vmem>>, vector<128x32xf32>,
    } else {
    }
    return
  }
  func.func @transform_0(%arg0: i32) -> (i32, i32) {
    %c0_i32 = arith.constant 0 : i32
    %c0_i32_0 = arith.constant 0 : i32
    return %arg0, %c0_i32 : i32, i32
  }
  func.func @transform_1(%arg0: i32) -> (i32, i32) {
    %c0_i32 = arith.constant 0 : i32
    %c0_i32_0 = arith.constant 0 : i32
    return %arg0, %c0_i32 : i32, i32
  }
  func.func @transform_2(%arg0: i32) -> (i32, i32) {
    %c0_i32 = arith.constant 0 : i32
    %c0_i32_0 = arith.constant 0 : i32
    return %arg0, %c0_i32 : i32, i32
  }
  func.func @transform_3(%arg0: i32) -> (i32, i32) {
    %c0_i32 = arith.constant 0 : i32
    %c0_i32_0 = arith.constant 0 : i32
    %c0_i32_1 = arith.constant 0 : i32
    return %c0_i32, %c0_i32_0 : i32, i32
  }
}

</mosaic_0001>

<bundles_post_ra>
// kernel: tpu_custom_call.1
= control target key start
LH: loop header
LB: loop body
LE: loop exit
PB: predicated region body
PF: predicated region fallthrough
CT: control target
= control target key end

     0   :  { %s1003_s0 = inlined_call_operand.vmem [shape: f32[128,128], index: 0, kind: input, shape index: {}]   ;;  %s1004_s1 = inlined_call_operand.vmem [shape: f32[128,32], index: 1, kind: input, shape index: {}]   ;;  %s1005_s2 = inlined_call_operand.hbm [shape: f32[128,128], index: 2, kind: output, shape index: {0}]   ;;  %s1006_s3 = inlined_call_operand.vmem [shape: f32[128,32], index: 3, kind: output, shape index: {1}]  }
   0x1   :  { %v14_v0 = vld [vmem:[%s1003_s0] sm:$0xff]  ;;  %v16_v1 = vld [vmem:[%s1003_s0 + $0x10] sm:$0xff]  ;;  %v15_v2 = vld [vmem:[%s1003_s0 + $0x8] sm:$0xff] }
   0x2   :  { %v30_v3 = vmul.f32 2.0, %v14_v0  ;;  %v32_v4 = vmul.f32 2.0, %v16_v1  ;;  %v17_v5 = vld [vmem:[%s1003_s0 + $0x18] sm:$0xff]  ;;  %v31_v6 = vmul.f32 2.0, %v15_v2  ;;  %v18_v8 = vld [vmem:[%s1003_s0 + $0x20] sm:$0xff]  ;;  %v19_v9 = vld [vmem:[%s1003_s0 + $0x28] sm:$0xff] }
   0x3   :  { %v33_v7 = vmul.f32 2.0, %v17_v5 }
   0x4   :  { %46 = vmax.xlane.f32.xlu0 %v30_v3  ;;  %50 = vmax.xlane.f32.xlu1 %v32_v4 }
   0x5   :  { %9 = vsyncpa [#allocation3], 0  ;;  %v34_v10 = vmul.f32 2.0, %v18_v8  ;;  %v35_v11 = vmul.f32 2.0, %v19_v9  ;;  %v20_v12 = vld [vmem:[%s1003_s0 + $0x30] sm:$0xff]  ;;  %v21_v13 = vld [vmem:[%s1003_s0 + $0x38] sm:$0xff] }
   0x6   :  { %v36_v14 = vmul.f32 2.0, %v20_v12  ;;  %v37_v15 = vmul.f32 2.0, %v21_v13  ;;  %v22_v16 = vld [vmem:[%s1003_s0 + $0x40] sm:$0xff]  ;;  %v23_v17 = vld [vmem:[%s1003_s0 + $0x48] sm:$0xff]  ;;  %v24_v20 = vld [vmem:[%s1003_s0 + $0x50] sm:$0xff] }
   0x7   :  { %v38_v18 = vmul.f32 2.0, %v22_v16  ;;  %v39_v19 = vmul.f32 2.0, %v23_v17  ;;  %v25_v21 = vld [vmem:[%s1003_s0 + $0x58] sm:$0xff]  ;;  %v779_v22 = vmul.f32 2.0, %v24_v20  ;;  %v26_v24 = vld [vmem:[%s1003_s0 + $0x60] sm:$0xff]  ;;  %v27_v25 = vld [vmem:[%s1003_s0 + $0x68] sm:$0xff] }
   0x8   :  { %48 = vmax.xlane.f32.xlu0 %v31_v6  ;;  %52 = vmax.xlane.f32.xlu1 %v33_v7  ;;  %v781_v23 = vmul.f32 2.0, %v25_v21  ;;  %v791_v26 = vmul.f32 2.0, %v26_v24  ;;  %v793_v27 = vmul.f32 2.0, %v27_v25  ;;  %v28_v28 = vld [vmem:[%s1003_s0 + $0x70] sm:$0xff]  ;;  %v29_v29 = vld [vmem:[%s1003_s0 + $0x78] sm:$0xff] }
   0x9   :  { %v803_v30 = vmul.f32 2.0, %v28_v28  ;;  %v805_v31 = vmul.f32 2.0, %v29_v29 }
   0xc   :  { %54 = vmax.xlane.f32.xlu0 %v34_v10  ;;  %56 = vmax.xlane.f32.xlu1 %v35_v11 }
  0x10   :  { %58 = vmax.xlane.f32.xlu0 %v36_v14  ;;  %60 = vmax.xlane.f32.xlu1 %v37_v15 }
  0x14   :  { %62 = vmax.xlane.f32.xlu0 %v38_v18  ;;  %64 = vmax.xlane.f32.xlu1 %v39_v19 }
  0x18   :  { %66 = vmax.xlane.f32.xlu0 %v779_v22  ;;  %68 = vmax.xlane.f32.xlu1 %v781_v23 }
  0x1c   :  { %70 = vmax.xlane.f32.xlu0 %v791_v26  ;;  %72 = vmax.xlane.f32.xlu1 %v793_v27 }
  0x20   :  { %74 = vmax.xlane.f32.xlu0 %v803_v30  ;;  %76 = vmax.xlane.f32.xlu1 %v805_v31 }
  0x91   :  { %v47_v32 = vpop.xlane.xlu0 %46  ;;  %v51_v33 = vpop.xlane.xlu1 %50 }
  0x92   :  { %v78_v34 = vsub.f32 %v30_v3, %v47_v32  ;;  %v80_v35 = vsub.f32 %v32_v4, %v51_v33  ;;  %v206_v32 = vld [vmem:[%s1004_s1] sm:$0xff]  ;;  %v207_v33 = vld [vmem:[%s1004_s1 + $0x8] sm:$0xff] }
  0x94   :  { %v94_v36 = vmul.f32 1.442695, %v78_v34  ;;  %v98_v37 = vmul.f32 1.442695, %v80_v35  ;;  %v208_v34 = vld [vmem:[%s1004_s1 + $0x10] sm:$0xff]  ;;  %v581_v35 = vpack.c.bf16 %v207_v33, %v206_v32 }
  0x95   :  { %v49_v38 = vpop.xlane.xlu0 %48  ;;  %v53_v39 = vpop.xlane.xlu1 %52 }
  0x96   :  { %632 = vpow2.f32 %v94_v36  ;;  %v79_v40 = vsub.f32 %v31_v6, %v49_v38  ;;  %v81_v41 = vsub.f32 %v33_v7, %v53_v39  ;;  %v209_v36 = vld [vmem:[%s1004_s1 + $0x18] sm:$0xff]  ;;  %v210_v38 = vld [vmem:[%s1004_s1 + $0x20] sm:$0xff]  ;;  %v211_v39 = vld [vmem:[%s1004_s1 + $0x28] sm:$0xff]  ;;  %582 = vmatprep.subr.bf16.mxu0 %v581_v35  ;;  %613 = vmatprep.subr.bf16.mxu1 %v581_v35 }
  0x97   :  { %634 = vpow2.f32 %v98_v37  ;;  %v585_v37 = vpack.c.bf16 %v209_v36, %v208_v34  ;;  %584 = vmatpush3.bf16.msra.mxu0 %v581_v35  ;;  %621 = vmatpush3.bf16.msra.mxu1 %v581_v35 }
  0x98   :  { %v96_v42 = vmul.f32 1.442695, %v79_v40  ;;  %v100_v43 = vmul.f32 1.442695, %v81_v41  ;;  %v589_v40 = vpack.c.bf16 %v211_v39, %v210_v38  ;;  %v212_v41 = vld [vmem:[%s1004_s1 + $0x30] sm:$0xff] }
  0x99   :  { %v55_v44 = vpop.xlane.xlu0 %54  ;;  %v57_v45 = vpop.xlane.xlu1 %56  ;;  %586 = vmatprep.subr.bf16.mxu0 %v585_v37  ;;  %614 = vmatprep.subr.bf16.mxu1 %v585_v37 }
  0x9a   :  { %636 = vpow2.f32 %v96_v42  ;;  %v82_v46 = vsub.f32 %v34_v10, %v55_v44  ;;  %v83_v47 = vsub.f32 %v35_v11, %v57_v45  ;;  %v213_v42 = vld [vmem:[%s1004_s1 + $0x38] sm:$0xff]  ;;  %v214_v44 = vld [vmem:[%s1004_s1 + $0x40] sm:$0xff]  ;;  %v215_v45 = vld [vmem:[%s1004_s1 + $0x48] sm:$0xff] }
  0x9b   :  { %638 = vpow2.f32 %v100_v43  ;;  %588 = vmatpush3.bf16.msra.mxu0 %v585_v37  ;;  %622 = vmatpush3.bf16.msra.mxu1 %v585_v37  ;;  %v593_v43 = vpack.c.bf16 %v213_v42, %v212_v41 }
  0x9c   :  { %v102_v48 = vmul.f32 1.442695, %v82_v46  ;;  %v104_v49 = vmul.f32 1.442695, %v83_v47  ;;  %590 = vmatprep.subr.bf16.mxu0 %v589_v40  ;;  %615 = vmatprep.subr.bf16.mxu1 %v589_v40  ;;  %v597_v46 = vpack.c.bf16 %v215_v45, %v214_v44  ;;  %v216_v47 = vld [vmem:[%s1004_s1 + $0x50] sm:$0xff] }
  0x9d   :  { %v59_v50 = vpop.xlane.xlu0 %58  ;;  %v61_v51 = vpop.xlane.xlu1 %60 }
  0x9e   :  { %640 = vpow2.f32 %v102_v48  ;;  %v84_v52 = vsub.f32 %v36_v14, %v59_v50  ;;  %v85_v53 = vsub.f32 %v37_v15, %v61_v51  ;;  %v217_v48 = vld [vmem:[%s1004_s1 + $0x58] sm:$0xff]  ;;  %v218_v50 = vld [vmem:[%s1004_s1 + $0x60] sm:$0xff]  ;;  %v219_v51 = vld [vmem:[%s1004_s1 + $0x68] sm:$0xff] }
  0x9f   :  { %642 = vpow2.f32 %v104_v49  ;;  %592 = vmatpush3.bf16.msra.mxu0 %v589_v40  ;;  %623 = vmatpush3.bf16.msra.mxu1 %v589_v40  ;;  %v601_v49 = vpack.c.bf16 %v217_v48, %v216_v47 }
  0xa0   :  { %v809_v54 = vpop.eup %632  ;;  %v106_v55 = vmul.f32 1.442695, %v84_v52  ;;  %v108_v56 = vmul.f32 1.442695, %v85_v53  ;;  %594 = vmatprep.subr.bf16.mxu0 %v593_v43  ;;  %616 = vmatprep.subr.bf16.mxu1 %v593_v43  ;;  %v605_v52 = vpack.c.bf16 %v219_v51, %v218_v50 }
  0xa1   :  { %126 = vadd.xlane.f32.xlu0 %v809_v54  ;;  %v63_v57 = vpop.xlane.xlu0 %62  ;;  %v65_v58 = vpop.xlane.xlu1 %64 }
  0xa2   :  { %v812_v59 = vpop.eup %634  ;;  %644 = vpow2.f32 %v106_v55  ;;  %v86_v60 = vsub.f32 %v38_v18, %v63_v57  ;;  %v87_v61 = vsub.f32 %v39_v19, %v65_v58 }
  0xa3   :  { %646 = vpow2.f32 %v108_v56  ;;  %596 = vmatpush3.bf16.msra.mxu0 %v593_v43  ;;  %624 = vmatpush3.bf16.msra.mxu1 %v593_v43 }
  0xa4   :  { %v814_v62 = vpop.eup %636  ;;  %v110_v63 = vmul.f32 1.442695, %v86_v60  ;;  %v112_v0 = vmul.f32 1.442695, %v87_v61  ;;  %598 = vmatprep.subr.bf16.mxu0 %v597_v46  ;;  %617 = vmatprep.subr.bf16.mxu1 %v597_v46 }
  0xa5   :  { %130 = vadd.xlane.f32.xlu0 %v812_v59  ;;  %128 = vadd.xlane.f32.xlu1 %v814_v62  ;;  %v67_v1 = vpop.xlane.xlu0 %66  ;;  %v69_v2 = vpop.xlane.xlu1 %68 }
  0xa6   :  { %v818_v3 = vpop.eup %638  ;;  %648 = vpow2.f32 %v110_v63  ;;  %v88_v4 = vsub.f32 %v779_v22, %v67_v1  ;;  %v89_v5 = vsub.f32 %v781_v23, %v69_v2  ;;  %v220_v1 = vld [vmem:[%s1004_s1 + $0x70] sm:$0xff]  ;;  %v221_v2 = vld [vmem:[%s1004_s1 + $0x78] sm:$0xff]  ;;  %s720_s1 = smov [#allocation2]  }
  0xa7   :  { %650 = vpow2.f32 %v112_v0  ;;  %600 = vmatpush3.bf16.msra.mxu0 %v597_v46  ;;  %625 = vmatpush3.bf16.msra.mxu1 %v597_v46  ;;  %s478_s20 = sshll.u32 %s720_s1, 4  ;;  %s479_s20 = int_to_ptr.vmem [resolvable:$true] %s478_s20 }
  0xa8   :  { %v822_v6 = vpop.eup %640  ;;  %v114_v7 = vmul.f32 1.442695, %v88_v4  ;;  %v116_v8 = vmul.f32 1.442695, %v89_v5  ;;  %602 = vmatprep.subr.bf16.mxu0 %v601_v49  ;;  %618 = vmatprep.subr.bf16.mxu1 %v601_v49  ;;  %v609_v4 = vpack.c.bf16 %v221_v2, %v220_v1  ;;  %s696_s21 = scalar_lea.vmem %s479_s20, 2048  ;;  %p701_p1 = scmp.lt.s32.totalorder %s479_s20, %s479_s20 }
  0xa9   :  { %132 = vadd.xlane.f32.xlu1 %v818_v3  ;;  %134 = vadd.xlane.f32.xlu0 %v822_v6  ;;  %v71_v9 = vpop.xlane.xlu0 %70  ;;  %v73_v10 = vpop.xlane.xlu1 %72  ;;  %p697_p0 = scmp.ne.s32.totalorder %s479_s20, %s696_s21  ;;  %p702_p2 = scmp.lt.s32.totalorder %s696_s21, %s696_s21 }
  0xaa   :  { %v826_v11 = vpop.eup %642  ;;  %652 = vpow2.f32 %v114_v7  ;;  %v90_v12 = vsub.f32 %v791_v26, %v71_v9  ;;  %v91_v13 = vsub.f32 %v793_v27, %v73_v10 }
  0xab   :  { %654 = vpow2.f32 %v116_v8  ;;  %604 = vmatpush3.bf16.msra.mxu0 %v601_v49  ;;  %626 = vmatpush3.bf16.msra.mxu1 %v601_v49  ;;  %p703_p3 = por %p702_p2, %p701_p1 }
  0xac   :  { %v830_v14 = vpop.eup %644  ;;  %v118_v15 = vmul.f32 1.442695, %v90_v12  ;;  %v120_v16 = vmul.f32 1.442695, %v91_v13  ;;  %606 = vmatprep.subr.bf16.mxu0 %v605_v52  ;;  %619 = vmatprep.subr.bf16.mxu1 %v605_v52 }
  0xad   :  { %136 = vadd.xlane.f32.xlu1 %v826_v11  ;;  %138 = vadd.xlane.f32.xlu0 %v830_v14  ;;  %v75_v17 = vpop.xlane.xlu0 %74  ;;  %v77_v18 = vpop.xlane.xlu1 %76  ;;  %p704_p4 = pnand %p703_p3, %p697_p0 }
  0xae   :  { %v834_v19 = vpop.eup %646  ;;  %656 = vpow2.f32 %v118_v15  ;;  %v92_v20 = vsub.f32 %v803_v30, %v75_v17  ;;  %v93_v21 = vsub.f32 %v805_v31, %v77_v18 }
  0xaf   :  { %658 = vpow2.f32 %v120_v16  ;;  %608 = vmatpush3.bf16.msra.mxu0 %v605_v52  ;;  %627 = vmatpush3.bf16.msra.mxu1 %v605_v52 }
  0xb0   :  { %v838_v22 = vpop.eup %648  ;;  %v122_v23 = vmul.f32 1.442695, %v92_v20  ;;  %v124_v24 = vmul.f32 1.442695, %v93_v21  ;;  %610 = vmatprep.subr.bf16.mxu0 %v609_v4  ;;  %620 = vmatprep.subr.bf16.mxu1 %v609_v4 }
  0xb1   :  { %140 = vadd.xlane.f32.xlu1 %v834_v19  ;;  %142 = vadd.xlane.f32.xlu0 %v838_v22  ;;  %v842_v25 = vpop.eup %650 }
  0xb2   :  { %660 = vpow2.f32 %v122_v23 }
  0xb3   :  { %662 = vpow2.f32 %v124_v24  ;;  %612 = vmatpush3.bf16.msra.mxu0 %v609_v4  ;;  %628 = vmatpush3.bf16.msra.mxu1 %v609_v4 }
  0xb4   :  { %v844_v26 = vpop.eup %652 }
  0xb5   :  { %144 = vadd.xlane.f32.xlu1 %v842_v25  ;;  %146 = vadd.xlane.f32.xlu0 %v844_v26  ;;  %v848_v27 = vpop.eup %654 }
  0xb8   :  { %v850_v28 = vpop.eup %656 }
  0xb9   :  { %148 = vadd.xlane.f32.xlu1 %v848_v27  ;;  %150 = vadd.xlane.f32.xlu0 %v850_v28  ;;  %v854_v29 = vpop.eup %658 }
  0xbc   :  { %v856_v30 = vpop.eup %660 }
  0xbd   :  { %152 = vadd.xlane.f32.xlu1 %v854_v29  ;;  %154 = vadd.xlane.f32.xlu0 %v856_v30  ;;  %v860_v31 = vpop.eup %662 }
  0xc1   :  { %156 = vadd.xlane.f32.xlu1 %v860_v31 }
 0x12e   :  { %v127_v53 = vpop.xlane.xlu0 %126 }
 0x12f   :  { %664 = vrcp.f32 %v127_v53 }
 0x132   :  { %v129_v55 = vpop.xlane.xlu1 %128  ;;  %v131_v56 = vpop.xlane.xlu0 %130 }
 0x133   :  { %666 = vrcp.f32 %v129_v55 }
 0x134   :  { %668 = vrcp.f32 %v131_v56 }
 0x136   :  { %v133_v57 = vpop.xlane.xlu1 %132  ;;  %v135_v58 = vpop.xlane.xlu0 %134 }
 0x137   :  { %670 = vrcp.f32 %v133_v57 }
 0x138   :  { %672 = vrcp.f32 %v135_v58 }
 0x139   :  { %v665_v60 = vpop.eup %664 }
 0x13a   :  { %v137_v61 = vpop.xlane.xlu1 %136  ;;  %v139_v63 = vpop.xlane.xlu0 %138  ;;  %v159_v0 = vmul.f32 %v665_v60, %v809_v54 }
 0x13b   :  { %674 = vrcp.f32 %v137_v61 }
 0x13c   :  { %676 = vrcp.f32 %v139_v63  ;;  %222 = vxpose.xlu0.b32.start [1/16] %v159_v0, 128  ;;  %190 = vst [vmem:[#allocation2] sm:$0xff] %v159_v0 }
 0x13d   :  { %v667_v5 = vpop.eup %666 }
 0x13e   :  { %v669_v7 = vpop.eup %668  ;;  %v141_v8 = vpop.xlane.xlu1 %140  ;;  %v161_v10 = vmul.f32 %v667_v5, %v814_v62 }
 0x13f   :  { %v143_v9 = vpop.xlane.xlu0 %142  ;;  %678 = vrcp.f32 %v141_v8  ;;  %v163_v54 = vmul.f32 %v669_v7, %v812_v59 }
 0x140   :  { %680 = vrcp.f32 %v143_v9  ;;  %191 = vst [vmem:[#allocation2 + $0x8] sm:$0xff] %v161_v10  ;;  %223 = vxpose.xlu0.b32.cont [2/16] %v161_v10, 128 }
 0x141   :  { %v671_v12 = vpop.eup %670  ;;  %192 = vst [vmem:[#allocation2 + $0x10] sm:$0xff] %v163_v54 }
 0x142   :  { %v673_v13 = vpop.eup %672  ;;  %v145_v15 = vpop.xlane.xlu1 %144  ;;  %v165_v17 = vmul.f32 %v671_v12, %v818_v3 }
 0x143   :  { %v147_v16 = vpop.xlane.xlu0 %146  ;;  %682 = vrcp.f32 %v145_v15  ;;  %v167_v62 = vmul.f32 %v673_v13, %v822_v6 }
 0x144   :  { %684 = vrcp.f32 %v147_v16  ;;  %224 = vxpose.xlu0.b32.cont [3/16] %v163_v54, 128  ;;  %193 = vst [vmem:[#allocation2 + $0x18] sm:$0xff] %v165_v17 }
 0x145   :  { %v675_v18 = vpop.eup %674  ;;  %194 = vst [vmem:[#allocation2 + $0x20] sm:$0xff] %v167_v62 }
 0x146   :  { %v677_v59 = vpop.eup %676  ;;  %v149_v20 = vpop.xlane.xlu1 %148  ;;  %v169_v23 = vmul.f32 %v675_v18, %v826_v11 }
 0x147   :  { %v151_v21 = vpop.xlane.xlu0 %150  ;;  %686 = vrcp.f32 %v149_v20  ;;  %v171_v24 = vmul.f32 %v677_v59, %v830_v14 }
 0x148   :  { %688 = vrcp.f32 %v151_v21  ;;  %225 = vxpose.xlu0.b32.cont [4/16] %v165_v17, 128  ;;  %195 = vst [vmem:[#allocation2 + $0x28] sm:$0xff] %v169_v23 }
 0x149   :  { %v679_v3 = vpop.eup %678  ;;  %196 = vst [vmem:[#allocation2 + $0x30] sm:$0xff] %v171_v24 }
 0x14a   :  { %v681_v32 = vpop.eup %680  ;;  %v153_v6 = vpop.xlane.xlu1 %152  ;;  %v173_v34 = vmul.f32 %v679_v3, %v834_v19 }
 0x14b   :  { %v155_v33 = vpop.xlane.xlu0 %154  ;;  %690 = vrcp.f32 %v153_v6  ;;  %v175_v35 = vmul.f32 %v681_v32, %v838_v22 }
 0x14c   :  { %692 = vrcp.f32 %v155_v33  ;;  %226 = vxpose.xlu0.b32.cont [5/16] %v167_v62, 128  ;;  %197 = vst [vmem:[#allocation2 + $0x38] sm:$0xff] %v173_v34 }
 0x14d   :  { %v683_v11 = vpop.eup %682  ;;  %198 = vst [vmem:[#allocation2 + $0x40] sm:$0xff] %v175_v35 }
 0x14e   :  { %v685_v36 = vpop.eup %684  ;;  %v157_v14 = vpop.xlane.xlu1 %156  ;;  %v177_v37 = vmul.f32 %v683_v11, %v842_v25 }
 0x14f   :  { %694 = vrcp.f32 %v157_v14  ;;  %v179_v38 = vmul.f32 %v685_v36, %v844_v26 }
 0x150   :  { %227 = vxpose.xlu0.b32.cont [6/16] %v169_v23, 128  ;;  %199 = vst [vmem:[#allocation2 + $0x48] sm:$0xff] %v177_v37 }
 0x151   :  { %v687_v39 = vpop.eup %686  ;;  %200 = vst [vmem:[#allocation2 + $0x50] sm:$0xff] %v179_v38 }
 0x152   :  { %v689_v19 = vpop.eup %688  ;;  %v181_v40 = vmul.f32 %v687_v39, %v848_v27 }
 0x153   :  { %v183_v22 = vmul.f32 %v689_v19, %v850_v28 }
 0x154   :  { %228 = vxpose.xlu0.b32.cont [7/16] %v171_v24, 128  ;;  %201 = vst [vmem:[#allocation2 + $0x58] sm:$0xff] %v181_v40 }
 0x155   :  { %v691_v41 = vpop.eup %690  ;;  %202 = vst [vmem:[#allocation2 + $0x60] sm:$0xff] %v183_v22 }
 0x156   :  { %v693_v42 = vpop.eup %692  ;;  %v185_v43 = vmul.f32 %v691_v41, %v854_v29 }
 0x157   :  { %v187_v25 = vmul.f32 %v693_v42, %v856_v30 }
 0x158   :  { %229 = vxpose.xlu0.b32.cont [8/16] %v173_v34, 128  ;;  %203 = vst [vmem:[#allocation2 + $0x68] sm:$0xff] %v185_v43 }
 0x159   :  { %v695_v26 = vpop.eup %694  ;;  %204 = vst [vmem:[#allocation2 + $0x70] sm:$0xff] %v187_v25 }
 0x15a   :  { %v189_v44 = vmul.f32 %v695_v26, %v860_v31 }
 0x15c   :  { %230 = vxpose.xlu0.b32.cont [9/16] %v175_v35, 128  ;;  %205 = vst [vmem:[#allocation2 + $0x78] sm:$0xff] %v189_v44 }
 0x160   :  { %231 = vxpose.xlu0.b32.cont [10/16] %v177_v37, 128 }
 0x164   :  { %232 = vxpose.xlu0.b32.cont [11/16] %v179_v38, 128 }
 0x168   :  { %233 = vxpose.xlu0.b32.cont [12/16] %v181_v40, 128 }
 0x16c   :  { %234 = vxpose.xlu0.b32.cont [13/16] %v183_v22, 128 }
 0x170   :  { %235 = vxpose.xlu0.b32.cont [14/16] %v185_v43, 128 }
 0x174   :  { %236 = vxpose.xlu0.b32.cont [15/16] %v187_v25, 128 }
 0x178   :  { %237 = vxpose.xlu0.b32.end [16/16] %v189_v44, 128 }
 0x1bc   :  { %v238_v27 = vpop.trf.xlu0 }
 0x1bd   :  { %557 = vmatprep.mubr.f32.mxu0 %v238_v27 }
 0x1c0   :  { %v239_v28 = vpop.trf.xlu0 }
 0x1c1   :  { %558 = vmatmul.mubr.f32.vlgmr.msra.gmra.mrb[0].mxu0 %v239_v28 }
 0x1c4   :  { %v240_v29 = vpop.trf.xlu0 }
 0x1c5   :  { %560 = vmatprep.mubr.f32.mxu0 %v240_v29 }
 0x1c8   :  { %v241_v30 = vpop.trf.xlu0 }
 0x1c9   :  { %561 = vmatmul.mubr.f32.gmra.mrb[2].mxu0 %v241_v30 }
 0x1cc   :  { %v242_v45 = vpop.trf.xlu0 }
 0x1cd   :  { %563 = vmatprep.mubr.f32.mxu0 %v242_v45 }
 0x1d0   :  { %v243_v31 = vpop.trf.xlu0 }
 0x1d1   :  { %564 = vmatmul.mubr.f32.gmra.mrb[4].mxu0 %v243_v31 }
 0x1d4   :  { %v244_v46 = vpop.trf.xlu0 }
 0x1d5   :  { %566 = vmatprep.mubr.f32.mxu0 %v244_v46 }
 0x1d8   :  { %v245_v47 = vpop.trf.xlu0 }
 0x1d9   :  { %567 = vmatmul.mubr.f32.gmra.mrb[6].mxu0 %v245_v47 }
 0x1dc   :  { %v246_v48 = vpop.trf.xlu0 }
 0x1dd   :  { %569 = vmatprep.mubr.f32.mxu1 %v246_v48 }
 0x1e0   :  { %v247_v49 = vpop.trf.xlu0 }
 0x1e1   :  { %570 = vmatmul.mubr.f32.vlgmr.msra.gmra.mrb[0].mxu1 %v247_v49 }
 0x1e4   :  { %v248_v50 = vpop.trf.xlu0 }
 0x1e5   :  { %572 = vmatprep.mubr.f32.mxu1 %v248_v50 }
 0x1e8   :  { %v249_v51 = vpop.trf.xlu0 }
 0x1e9   :  { %573 = vmatmul.mubr.f32.gmra.mrb[2].mxu1 %v249_v51 }
 0x1ec   :  { %v250_v52 = vpop.trf.xlu0 }
 0x1ed   :  { %575 = vmatprep.mubr.f32.mxu1 %v250_v52 }
 0x1f0   :  { %v251_v53 = vpop.trf.xlu0 }
 0x1f1   :  { %576 = vmatmul.mubr.f32.gmra.mrb[4].mxu1 %v251_v53 }
 0x1f4   :  { %v252_v55 = vpop.trf.xlu0 }
 0x1f5   :  { %578 = vmatprep.mubr.f32.mxu1 %v252_v55 }
 0x1f8   :  { %v253_v56 = vpop.trf.xlu0 }
 0x1f9   :  { %579 = vmatmul.mubr.f32.gmra.mrb[6].mxu1 %v253_v56 }
 0x1fa   :  { %707 = shalt.err (!%p704_p4)
}
 0x1fb   :  { %s708_s24 = scalar_lea.hbm %s1005_s2, 2048 }
 0x1fc   :  { %p709_p5 = scmp.ne.s32.totalorder %s1005_s2, %s708_s24  ;;  %p712_p6 = scmp.lt.u32.totalorder %s708_s24, %s1005_s2 }
 0x1fe   :  { %p714_p7 = pnand %p712_p6, %p709_p5 }
 0x200   :  { %717 = shalt.err (!%p714_p7)
}
 0x201   :  { %s721_s29 = smov 128   ;;  %s722_s30 = smov 8   ;;  %vm403_vm0 = vcmask 261120  }
 0x202   :  { %484 = dma.vmem_to_hbm [thread:$0]  %s479_s20, 2048, %s1005_s2, [#allocation3], %s721_s29, %s721_s29, %s722_s30  }
 0x294   :  { %v559_v57 = vpop.f32.mrb[0].mxu0 }
 0x295   :  { %405 = vst.msk [vmem:[%s1006_s3 + $0x8] sm:$0xff] %vm403_vm0, %v559_v57  ;;  %v320_v58 = vpop.f32.mrb[1].mxu0 }
 0x296   :  { %404 = vst.msk [vmem:[%s1006_s3] sm:$0xff] %vm403_vm0, %v320_v58 }
 0x29c   :  { %v562_v60 = vpop.f32.mrb[2].mxu0 }
 0x29d   :  { %407 = vst.msk [vmem:[%s1006_s3 + $0x18] sm:$0xff] %vm403_vm0, %v562_v60  ;;  %v330_v61 = vpop.f32.mrb[3].mxu0 }
 0x29e   :  { %406 = vst.msk [vmem:[%s1006_s3 + $0x10] sm:$0xff] %vm403_vm0, %v330_v61 }
 0x2a4   :  { %v565_v63 = vpop.f32.mrb[4].mxu0 }
 0x2a5   :  { %409 = vst.msk [vmem:[%s1006_s3 + $0x28] sm:$0xff] %vm403_vm0, %v565_v63  ;;  %v340_v0 = vpop.f32.mrb[5].mxu0 }
 0x2a6   :  { %408 = vst.msk [vmem:[%s1006_s3 + $0x20] sm:$0xff] %vm403_vm0, %v340_v0 }
 0x2ac   :  { %v568_v1 = vpop.f32.mrb[6].mxu0 }
 0x2ad   :  { %411 = vst.msk [vmem:[%s1006_s3 + $0x38] sm:$0xff] %vm403_vm0, %v568_v1  ;;  %v350_v2 = vpop.f32.mrb[7].mxu0 }
 0x2ae   :  { %410 = vst.msk [vmem:[%s1006_s3 + $0x30] sm:$0xff] %vm403_vm0, %v350_v2 }
 0x2b4   :  { %v571_v4 = vpop.f32.mrb[0].mxu1 }
 0x2b5   :  { %413 = vst.msk [vmem:[%s1006_s3 + $0x48] sm:$0xff] %vm403_vm0, %v571_v4  ;;  %v360_v5 = vpop.f32.mrb[1].mxu1 }
 0x2b6   :  { %412 = vst.msk [vmem:[%s1006_s3 + $0x40] sm:$0xff] %vm403_vm0, %v360_v5 }
 0x2bc   :  { %v574_v7 = vpop.f32.mrb[2].mxu1 }
 0x2bd   :  { %415 = vst.msk [vmem:[%s1006_s3 + $0x58] sm:$0xff] %vm403_vm0, %v574_v7  ;;  %v370_v8 = vpop.f32.mrb[3].mxu1 }
 0x2be   :  { %414 = vst.msk [vmem:[%s1006_s3 + $0x50] sm:$0xff] %vm403_vm0, %v370_v8 }
 0x2c4   :  { %v577_v9 = vpop.f32.mrb[4].mxu1 }
 0x2c5   :  { %417 = vst.msk [vmem:[%s1006_s3 + $0x68] sm:$0xff] %vm403_vm0, %v577_v9  ;;  %v380_v10 = vpop.f32.mrb[5].mxu1 }
 0x2c6   :  { %416 = vst.msk [vmem:[%s1006_s3 + $0x60] sm:$0xff] %vm403_vm0, %v380_v10 }
 0x2cc   :  { %v580_v54 = vpop.f32.mrb[6].mxu1 }
 0x2cd   :  { %419 = vst.msk [vmem:[%s1006_s3 + $0x78] sm:$0xff] %vm403_vm0, %v580_v54  ;;  %v390_v12 = vpop.f32.mrb[7].mxu1 }
 0x2ce   :  { %418 = vst.msk [vmem:[%s1006_s3 + $0x70] sm:$0xff] %vm403_vm0, %v390_v12 }
 0x2cf   :  { %718 = dma.done.wait [#allocation3], 2048  }
 0x2d0   :  { %719 = vsyncadd [#allocation3], 4294965248 }
 0x2d1   :  { %492 = vsyncpa [#allocation3], 1 }

</bundles_post_ra>
